<compile_context>
chip_gen: v6e
topology: v6e:2x2x1
jax: 0.10.0
libtpu: 0.0.40
codegen_flags: <defaults>
</compile_context>

<pallas_src>
import functools
import math

import jax
import jax.numpy as jnp
from jax.experimental import pallas as pl
from jax.experimental.pallas import tpu as pltpu


# ---------------------------------------------------------------------------
# Kernel
# ---------------------------------------------------------------------------
def _layernorm(x, gamma, beta, eps=1e-5):
    mean = jnp.mean(x, axis=-1, keepdims=True)
    var = jnp.mean((x - mean) ** 2, axis=-1, keepdims=True)
    return (x - mean) * jax.lax.rsqrt(var + eps) * gamma + beta


def encoder_block_kernel(
    # scalar-prefetch refs
    valid_lens_ref,            # SMEM (B,) int32
    # input refs (one grid step == one batch element)
    x_ref,                     # (T, H) f32
    wq_ref, wk_ref, wv_ref,    # (H, H) bf16
    wo3_ref,                   # (NH, D, H) bf16  — W_o pre-split per head
    w1_ref,                    # (H, F) bf16
    w2_ref,                    # (F, H) bf16
    vec_ref,                   # (5, H) f32: rows = [g1, be1, g2, be2, b2]
    b1_ref,                    # (1, F) f32
    # output ref
    out_ref,                   # (T, H) f32
    *,
    seq_len: int,
    num_heads: int,
):
    T, NH = seq_len, num_heads
    x = x_ref[...]                               # (T, H) f32
    H = x.shape[-1]
    D = H // NH
    xb = x.astype(jnp.bfloat16)

    # --- Q/K/V projections: large 2-D matmuls (bf16 in, f32 acc) -------------
    q = jnp.dot(xb, wq_ref[...], preferred_element_type=jnp.float32)
    k = jnp.dot(xb, wk_ref[...], preferred_element_type=jnp.float32)
    v = jnp.dot(xb, wv_ref[...], preferred_element_type=jnp.float32)

    # One relayout + one whole-array bf16 cast per tensor (no per-head slices).
    def split_heads(t):                          # (T, H) f32 -> (NH, T, D) bf16
        return jnp.swapaxes(t.reshape(T, NH, D), 0, 1).astype(jnp.bfloat16)

    qh, kh, vh = split_heads(q), split_heads(k), split_heads(v)

    # --- batched scaled dot-product attention over all heads at once ---------
    s = jnp.einsum("hqd,hkd->hqk", qh, kh,
                   preferred_element_type=jnp.float32)
    s = s * (1.0 / math.sqrt(D))                 # (NH, T, T) f32

    vlen = valid_lens_ref[pl.program_id(0)]      # per-batch valid length
    key_pos = jax.lax.broadcasted_iota(jnp.int32, (1, 1, T), 2)
    s = jnp.where(key_pos < vlen, s, -1000000.0)  # matches masked_softmax
    s = s - jnp.max(s, axis=-1, keepdims=True)
    p = jnp.exp(s)
    p = p * pl.reciprocal(jnp.sum(p, axis=-1, keepdims=True), approx=True)

    o = jnp.einsum("hqk,hkd->hqd", p.astype(jnp.bfloat16), vh,
                   preferred_element_type=jnp.float32)           # (NH, T, D) f32

    # --- fused W_o: per-head batched matmul, then reduce over heads ----------
    y = jnp.sum(
        jnp.einsum("hqd,hdn->hqn", o.astype(jnp.bfloat16), wo3_ref[...],
                   preferred_element_type=jnp.float32),
        axis=0)                                                  # (T, H) f32

    vecs = vec_ref[...]
    g1, be1 = vecs[0:1, :], vecs[1:2, :]
    g2, be2 = vecs[2:3, :], vecs[3:4, :]
    b2 = vecs[4:5, :]

    # --- AddNorm 1 (dropout == identity in inference mode) -------------------
    z = _layernorm(x + y, g1, be1)

    # --- position-wise FFN ----------------------------------------------------
    f = jnp.dot(z.astype(jnp.bfloat16), w1_ref[...],
                preferred_element_type=jnp.float32) + b1_ref[...]
    f = jnp.maximum(f, 0.0)
    f = jnp.dot(f.astype(jnp.bfloat16), w2_ref[...],
                preferred_element_type=jnp.float32) + b2

    # --- AddNorm 2 -------------------------------------------------------------
    out_ref[...] = _layernorm(z + f, g2, be2)


# ---------------------------------------------------------------------------
# One-time parameter packing (hoisted out of the per-call wrapper)
# ---------------------------------------------------------------------------
def pack_params(params, num_heads):
    H = params["wq"].shape[0]
    d = H // num_heads
    bf = lambda a: a.astype(jnp.bfloat16)
    return {
        "wq": bf(params["wq"]),
        "wk": bf(params["wk"]),
        "wv": bf(params["wv"]),
        "wo3": bf(params["wo"]).reshape(num_heads, d, H),   # per-head W_o slabs
        "w1": bf(params["w1"]),
        "w2": bf(params["w2"]),
        "vecs": jnp.concatenate(
            [params["g1"], params["be1"], params["g2"], params["be2"],
             params["b2"]], axis=0),                          # (5, H) f32
        "b1": params["b1"],                                   # (1, F) f32
    }


# ---------------------------------------------------------------------------
# Wrapper
# ---------------------------------------------------------------------------
def encoder_block(x, valid_lens, packed, num_heads):
    B, T, H = x.shape
    F = packed["w1"].shape[1]
    D = H // num_heads

    x2d = x.reshape(B * T, H)

    def const_spec(shape):
        return pl.BlockSpec(shape, lambda b, vl, _n=len(shape): (0,) * _n)

    grid_spec = pltpu.PrefetchScalarGridSpec(
        num_scalar_prefetch=1,                   # valid_lens -> SMEM
        grid=(B,),                               # one batch element per step
        in_specs=[
            pl.BlockSpec((T, H), lambda b, vl: (b, 0)),   # x rows of batch b
            const_spec((H, H)), const_spec((H, H)), const_spec((H, H)),
            const_spec((num_heads, D, H)),                # wo3
            const_spec((H, F)), const_spec((F, H)),       # FFN weights
            const_spec((5, H)),                           # packed affine/bias vecs
            const_spec((1, F)),                           # b1
        ],
        out_specs=pl.BlockSpec((T, H), lambda b, vl: (b, 0)),
    )

    kernel = functools.partial(
        encoder_block_kernel, seq_len=T, num_heads=num_heads)

    out2d = pl.pallas_call(
        kernel,
        out_shape=jax.ShapeDtypeStruct((B * T, H), jnp.float32),
        grid_spec=grid_spec,
        compiler_params=pltpu.CompilerParams(
            dimension_semantics=("parallel",),   # batches can split across TCs
            vmem_limit_bytes=32 * 1024 * 1024,   # tiny footprint at these sizes
        ),
    )(
        valid_lens,
        x2d,
        packed["wq"], packed["wk"], packed["wv"], packed["wo3"],
        packed["w1"], packed["w2"], packed["vecs"], packed["b1"],
    )
    return out2d.reshape(B, T, H)


# ---------------------------------------------------------------------------
# Pure-JAX reference (fp32, same math as the PyTorch module) for verification
# ---------------------------------------------------------------------------
def encoder_block_ref(x, valid_lens, params, num_heads):
    B, T, H = x.shape
    d = H // num_heads

    def split_heads(t):  # [B,T,H] -> [B*nh, T, d]
        t = t.reshape(B, T, num_heads, d).transpose(0, 2, 1, 3)
        return t.reshape(B * num_heads, T, d)

    q = split_heads(x @ params["wq"])
    k = split_heads(x @ params["wk"])
    v = split_heads(x @ params["wv"])
    s = jnp.einsum("bqd,bkd->bqk", q, k) / math.sqrt(d)
    vl = jnp.repeat(valid_lens, num_heads)                       # [B*nh]
    mask = jnp.arange(T)[None, None, :] < vl[:, None, None]
    s = jnp.where(mask, s, -1000000.0)
    p = jax.nn.softmax(s, axis=-1)
    o = jnp.einsum("bqk,bkd->bqd", p, v)
    o = o.reshape(B, num_heads, T, d).transpose(0, 2, 1, 3).reshape(B, T, H)
    y = o @ params["wo"]

    def ln(t, g, b):
        m = t.mean(-1, keepdims=True)
        var = ((t - m) ** 2).mean(-1, keepdims=True)
        return (t - m) / jnp.sqrt(var + 1e-5) * g + b

    z = ln(x + y, params["g1"], params["be1"])
    f = jnp.maximum(z @ params["w1"] + params["b1"], 0.0) @ params["w2"] + params["b2"]
    return ln(z + f, params["g2"], params["be2"])


# ---------------------------------------------------------------------------
if __name__ == "__main__":
    # Small hyper-parameters consistent with the module's __init__
    # (query_size = key_size = value_size = num_hiddens / num_heads).
    B, T, H = 2, 8, 32
    NUM_HEADS = 4
    FFN_HIDDENS = 64

    key = jax.random.PRNGKey(0)
    ks = jax.random.split(key, 10)

    def init(k, shape, scale=0.1):
        return jax.random.normal(k, shape, jnp.float32) * scale

    params = {
        "wq": init(ks[0], (H, H)),
        "wk": init(ks[1], (H, H)),
        "wv": init(ks[2], (H, H)),
        "wo": init(ks[3], (H, H)),
        "g1": jnp.ones((1, H), jnp.float32),
        "be1": jnp.zeros((1, H), jnp.float32),
        "w1": init(ks[4], (H, FFN_HIDDENS)),
        "b1": init(ks[5], (1, FFN_HIDDENS)),
        "w2": init(ks[6], (FFN_HIDDENS, H)),
        "b2": init(ks[7], (1, H)),
        "g2": jnp.ones((1, H), jnp.float32),
        "be2": jnp.zeros((1, H), jnp.float32),
    }

    x = jax.random.normal(ks[8], (B, T, H), jnp.float32)
    valid_lens = jnp.array([5, 8], dtype=jnp.int32)   # [B,]

    packed = pack_params(params, NUM_HEADS)           # one-time pre-pack / bf16 cast

    out = encoder_block(x, valid_lens, packed, NUM_HEADS)
    out = jax.block_until_ready(out)

    ref = encoder_block_ref(x, valid_lens, params, NUM_HEADS)
    assert out.shape == (B, T, H)
    # bf16 MXU inputs + approx reciprocal => loosened tolerance vs fp32 reference.
    max_err = float(jnp.max(jnp.abs(out - ref)))
    assert max_err < 3e-2, f"max abs err {max_err}"

    print("KERNEL_OK")
</pallas_src>

<mosaic_0001>
module attributes {stable_mosaic.version = 11 : i64} {
  func.func @encoder_block_kernel(%arg0: i32, %arg1: memref<2xi32, #tpu.memory_space<smem>>, %arg2: memref<8x32xf32, #tpu.memory_space<vmem>>, %arg3: memref<32x32xbf16, #tpu.memory_space<vmem>>, %arg4: memref<32x32xbf16, #tpu.memory_space<vmem>>, %arg5: memref<32x32xbf16, #tpu.memory_space<vmem>>, %arg6: memref<4x8x32xbf16, #tpu.memory_space<vmem>>, %arg7: memref<32x64xbf16, #tpu.memory_space<vmem>>, %arg8: memref<64x32xbf16, #tpu.memory_space<vmem>>, %arg9: memref<5x32xf32, #tpu.memory_space<vmem>>, %arg10: memref<1x64xf32, #tpu.memory_space<vmem>>, %arg11: memref<8x32xf32, #tpu.memory_space<vmem>>) attributes {dimension_semantics = [#tpu.dimension_semantics<parallel>], iteration_bounds = array<i64: 2>, scalar_prefetch = 1 : i64, scratch_operands = 0 : i64, tpu.core_type = #tpu.core_type<tc>, window_params = [{transform_indices = @transform_0, window_bounds = array<i64: 8, 32>}, {pipeline_mode = #tpu.pipeline_mode<synchronous>, transform_indices = @transform_1, window_bounds = array<i64: 32, 32>}, {pipeline_mode = #tpu.pipeline_mode<synchronous>, transform_indices = @transform_2, window_bounds = array<i64: 32, 32>}, {pipeline_mode = #tpu.pipeline_mode<synchronous>, transform_indices = @transform_3, window_bounds = array<i64: 32, 32>}, {pipeline_mode = #tpu.pipeline_mode<synchronous>, transform_indices = @transform_4, window_bounds = array<i64: 4, 8, 32>}, {pipeline_mode = #tpu.pipeline_mode<synchronous>, transform_indices = @transform_5, window_bounds = array<i64: 32, 64>}, {pipeline_mode = #tpu.pipeline_mode<synchronous>, transform_indices = @transform_6, window_bounds = array<i64: 64, 32>}, {pipeline_mode = #tpu.pipeline_mode<synchronous>, transform_indices = @transform_7, window_bounds = array<i64: 5, 32>}, {pipeline_mode = #tpu.pipeline_mode<synchronous>, transform_indices = @transform_8, window_bounds = array<i64: 1, 64>}, {transform_indices = @transform_9, window_bounds = array<i64: 8, 32>}]} {
    %c0 = arith.constant 0 : index
    %c0_0 = arith.constant 0 : index
    %0 = vector.load %arg2[%c0, %c0_0] : memref<8x32xf32, #tpu.memory_space<vmem>>, vector<8x32xf32>
    %1 = arith.truncf %0 : vector<8x32xf32> to vector<8x32xbf16>
    %c0_1 = arith.constant 0 : index
    %c0_2 = arith.constant 0 : index
    %2 = vector.load %arg3[%c0_1, %c0_2] : memref<32x32xbf16, #tpu.memory_space<vmem>>, vector<32x32xbf16>
    %cst = arith.constant dense<0.000000e+00> : vector<8x32xf32>
    %3 = tpu.matmul %1, %2, %cst {dimension_numbers = #tpu.dot_dimension_numbers<[1], [0], [0], [1], [0, 0, 1, 1], [], []>} : vector<8x32xbf16>, vector<32x32xbf16>, vector<8x32xf32> -> vector<8x32xf32>
    %c0_3 = arith.constant 0 : index
    %c0_4 = arith.constant 0 : index
    %4 = vector.load %arg4[%c0_3, %c0_4] : memref<32x32xbf16, #tpu.memory_space<vmem>>, vector<32x32xbf16>
    %cst_5 = arith.constant dense<0.000000e+00> : vector<8x32xf32>
    %5 = tpu.matmul %1, %4, %cst_5 {dimension_numbers = #tpu.dot_dimension_numbers<[1], [0], [0], [1], [0, 0, 1, 1], [], []>} : vector<8x32xbf16>, vector<32x32xbf16>, vector<8x32xf32> -> vector<8x32xf32>
    %c0_6 = arith.constant 0 : index
    %c0_7 = arith.constant 0 : index
    %6 = vector.load %arg5[%c0_6, %c0_7] : memref<32x32xbf16, #tpu.memory_space<vmem>>, vector<32x32xbf16>
    %cst_8 = arith.constant dense<0.000000e+00> : vector<8x32xf32>
    %7 = tpu.matmul %1, %6, %cst_8 {dimension_numbers = #tpu.dot_dimension_numbers<[1], [0], [0], [1], [0, 0, 1, 1], [], []>} : vector<8x32xbf16>, vector<32x32xbf16>, vector<8x32xf32> -> vector<8x32xf32>
    %8 = vector.shape_cast %3 : vector<8x32xf32> to vector<8x4x8xf32>
    %9 = tpu.transpose %8, [1, 0, 2] : vector<8x4x8xf32> -> vector<4x8x8xf32>
    %10 = arith.truncf %9 : vector<4x8x8xf32> to vector<4x8x8xbf16>
    %11 = vector.shape_cast %5 : vector<8x32xf32> to vector<8x4x8xf32>
    %12 = tpu.transpose %11, [1, 0, 2] : vector<8x4x8xf32> -> vector<4x8x8xf32>
    %13 = arith.truncf %12 : vector<4x8x8xf32> to vector<4x8x8xbf16>
    %14 = vector.shape_cast %7 : vector<8x32xf32> to vector<8x4x8xf32>
    %15 = tpu.transpose %14, [1, 0, 2] : vector<8x4x8xf32> -> vector<4x8x8xf32>
    %16 = arith.truncf %15 : vector<4x8x8xf32> to vector<4x8x8xbf16>
    "tpu.trace_start"() <{level = 10 : i32, message = "hqd,hkd->hqk"}> : () -> ()
    %cst_9 = arith.constant dense<0.000000e+00> : vector<4x8x8xf32>
    %17 = tpu.matmul %10, %13, %cst_9 {dimension_numbers = #tpu.dot_dimension_numbers<[2], [2], [1], [1], [0, 0, 0, 1, 1, 1], [0], [0]>} : vector<4x8x8xbf16>, vector<4x8x8xbf16>, vector<4x8x8xf32> -> vector<4x8x8xf32>
    "tpu.trace_stop"() : () -> ()
    %cst_10 = arith.constant 0.353553385 : f32
    %18 = vector.broadcast %cst_10 : f32 to vector<4x8x8xf32>
    %19 = arith.mulf %17, %18 : vector<4x8x8xf32>
    %20 = arith.index_cast %arg0 : i32 to index
    %21 = memref.load %arg1[%20] : memref<2xi32, #tpu.memory_space<smem>>
    %22 = tpu.iota {dimensions = array<i32: 2>} : vector<1x1x8xi32>
    %23 = vector.broadcast %21 : i32 to vector<1x1x8xi32>
    %24 = arith.cmpi slt, %22, %23 : vector<1x1x8xi32>
    %cst_11 = arith.constant -1.000000e+06 : f32
    %25 = vector.shape_cast %24 : vector<1x1x8xi1> to vector<1x1x8xi1>
    %26 = vector.broadcast %25 : vector<1x1x8xi1> to vector<4x8x8xi1>
    %27 = vector.broadcast %cst_11 : f32 to vector<4x8x8xf32>
    %28 = arith.select %26, %19, %27 : vector<4x8x8xi1>, vector<4x8x8xf32>
    %cst_12 = arith.constant dense<0xFF800000> : vector<4x8xf32>
    %29 = vector.multi_reduction <maximumf>, %28, %cst_12 [2] : vector<4x8x8xf32> to vector<4x8xf32>
    %30 = vector.shape_cast %29 : vector<4x8xf32> to vector<4x8x1xf32>
    %31 = vector.broadcast %30 : vector<4x8x1xf32> to vector<4x8x8xf32>
    %32 = arith.subf %28, %31 : vector<4x8x8xf32>
    %33 = math.exp %32 : vector<4x8x8xf32>
    %cst_13 = arith.constant dense<0.000000e+00> : vector<4x8xf32>
    %34 = vector.multi_reduction <add>, %33, %cst_13 [2] : vector<4x8x8xf32> to vector<4x8xf32>
    %35 = vector.shape_cast %34 : vector<4x8xf32> to vector<4x8x1xf32>
    %36 = tpu.reciprocal %35 {approx = true} : vector<4x8x1xf32> -> vector<4x8x1xf32>
    %37 = vector.broadcast %36 : vector<4x8x1xf32> to vector<4x8x8xf32>
    %38 = arith.mulf %33, %37 : vector<4x8x8xf32>
    %39 = arith.truncf %38 : vector<4x8x8xf32> to vector<4x8x8xbf16>
    "tpu.trace_start"() <{level = 10 : i32, message = "hqk,hkd->hqd"}> : () -> ()
    %cst_14 = arith.constant dense<0.000000e+00> : vector<4x8x8xf32>
    %40 = tpu.matmul %39, %16, %cst_14 {dimension_numbers = #tpu.dot_dimension_numbers<[2], [1], [1], [2], [0, 0, 0, 1, 1, 2], [0], [0]>} : vector<4x8x8xbf16>, vector<4x8x8xbf16>, vector<4x8x8xf32> -> vector<4x8x8xf32>
    "tpu.trace_stop"() : () -> ()
    %41 = arith.truncf %40 : vector<4x8x8xf32> to vector<4x8x8xbf16>
    %c0_15 = arith.constant 0 : index
    %c0_16 = arith.constant 0 : index
    %c0_17 = arith.constant 0 : index
    %42 = vector.load %arg6[%c0_15, %c0_16, %c0_17] : memref<4x8x32xbf16, #tpu.memory_space<vmem>>, vector<4x8x32xbf16>
    "tpu.trace_start"() <{level = 10 : i32, message = "hqd,hdn->hqn"}> : () -> ()
    %cst_18 = arith.constant dense<0.000000e+00> : vector<4x8x32xf32>
    %43 = tpu.matmul %41, %42, %cst_18 {dimension_numbers = #tpu.dot_dimension_numbers<[2], [1], [1], [2], [0, 0, 0, 1, 1, 2], [0], [0]>} : vector<4x8x8xbf16>, vector<4x8x32xbf16>, vector<4x8x32xf32> -> vector<4x8x32xf32>
    "tpu.trace_stop"() : () -> ()
    %cst_19 = arith.constant dense<0.000000e+00> : vector<8x32xf32>
    %44 = vector.multi_reduction <add>, %43, %cst_19 [0] : vector<4x8x32xf32> to vector<8x32xf32>
    %c0_20 = arith.constant 0 : index
    %c0_21 = arith.constant 0 : index
    %45 = vector.load %arg9[%c0_20, %c0_21] : memref<5x32xf32, #tpu.memory_space<vmem>>, vector<5x32xf32>
    %46 = vector.extract_strided_slice %45 {offsets = [0, 0], sizes = [1, 32], strides = [1, 1]} : vector<5x32xf32> to vector<1x32xf32>
    %47 = vector.extract_strided_slice %45 {offsets = [1, 0], sizes = [1, 32], strides = [1, 1]} : vector<5x32xf32> to vector<1x32xf32>
    %48 = vector.extract_strided_slice %45 {offsets = [2, 0], sizes = [1, 32], strides = [1, 1]} : vector<5x32xf32> to vector<1x32xf32>
    %49 = vector.extract_strided_slice %45 {offsets = [3, 0], sizes = [1, 32], strides = [1, 1]} : vector<5x32xf32> to vector<1x32xf32>
    %50 = vector.extract_strided_slice %45 {offsets = [4, 0], sizes = [1, 32], strides = [1, 1]} : vector<5x32xf32> to vector<1x32xf32>
    %51 = arith.addf %0, %44 : vector<8x32xf32>
    %cst_22 = arith.constant dense<0.000000e+00> : vector<8xf32>
    %52 = vector.multi_reduction <add>, %51, %cst_22 [1] : vector<8x32xf32> to vector<8xf32>
    %53 = vector.shape_cast %52 : vector<8xf32> to vector<8x1xf32>
    %cst_23 = arith.constant 3.200000e+01 : f32
    %54 = vector.broadcast %cst_23 : f32 to vector<8x1xf32>
    %55 = arith.divf %53, %54 : vector<8x1xf32>
    %56 = vector.broadcast %55 : vector<8x1xf32> to vector<8x32xf32>
    %57 = arith.subf %51, %56 : vector<8x32xf32>
    %58 = arith.mulf %57, %57 : vector<8x32xf32>
    %cst_24 = arith.constant dense<0.000000e+00> : vector<8xf32>
    %59 = vector.multi_reduction <add>, %58, %cst_24 [1] : vector<8x32xf32> to vector<8xf32>
    %60 = vector.shape_cast %59 : vector<8xf32> to vector<8x1xf32>
    %cst_25 = arith.constant 3.200000e+01 : f32
    %61 = vector.broadcast %cst_25 : f32 to vector<8x1xf32>
    %62 = arith.divf %60, %61 : vector<8x1xf32>
    %63 = vector.broadcast %55 : vector<8x1xf32> to vector<8x32xf32>
    %64 = arith.subf %51, %63 : vector<8x32xf32>
    %cst_26 = arith.constant 9.99999974E-6 : f32
    %65 = vector.broadcast %cst_26 : f32 to vector<8x1xf32>
    %66 = arith.addf %62, %65 : vector<8x1xf32>
    %67 = math.rsqrt %66 : vector<8x1xf32>
    %68 = vector.broadcast %67 : vector<8x1xf32> to vector<8x32xf32>
    %69 = arith.mulf %64, %68 : vector<8x32xf32>
    %70 = vector.broadcast %46 : vector<1x32xf32> to vector<8x32xf32>
    %71 = arith.mulf %69, %70 : vector<8x32xf32>
    %72 = vector.broadcast %47 : vector<1x32xf32> to vector<8x32xf32>
    %73 = arith.addf %71, %72 : vector<8x32xf32>
    %74 = arith.truncf %73 : vector<8x32xf32> to vector<8x32xbf16>
    %c0_27 = arith.constant 0 : index
    %c0_28 = arith.constant 0 : index
    %75 = vector.load %arg7[%c0_27, %c0_28] : memref<32x64xbf16, #tpu.memory_space<vmem>>, vector<32x64xbf16>
    %cst_29 = arith.constant dense<0.000000e+00> : vector<8x64xf32>
    %76 = tpu.matmul %74, %75, %cst_29 {dimension_numbers = #tpu.dot_dimension_numbers<[1], [0], [0], [1], [0, 0, 1, 1], [], []>} : vector<8x32xbf16>, vector<32x64xbf16>, vector<8x64xf32> -> vector<8x64xf32>
    %c0_30 = arith.constant 0 : index
    %c0_31 = arith.constant 0 : index
    %77 = vector.load %arg10[%c0_30, %c0_31] : memref<1x64xf32, #tpu.memory_space<vmem>>, vector<1x64xf32>
    %78 = vector.broadcast %77 : vector<1x64xf32> to vector<8x64xf32>
    %79 = arith.addf %76, %78 : vector<8x64xf32>
    %cst_32 = arith.constant 0.000000e+00 : f32
    %80 = vector.broadcast %cst_32 : f32 to vector<8x64xf32>
    %81 = arith.maximumf %79, %80 : vector<8x64xf32>
    %82 = arith.truncf %81 : vector<8x64xf32> to vector<8x64xbf16>
    %c0_33 = arith.constant 0 : index
    %c0_34 = arith.constant 0 : index
    %83 = vector.load %arg8[%c0_33, %c0_34] : memref<64x32xbf16, #tpu.memory_space<vmem>>, vector<64x32xbf16>
    %cst_35 = arith.constant dense<0.000000e+00> : vector<8x32xf32>
    %84 = tpu.matmul %82, %83, %cst_35 {dimension_numbers = #tpu.dot_dimension_numbers<[1], [0], [0], [1], [0, 0, 1, 1], [], []>} : vector<8x64xbf16>, vector<64x32xbf16>, vector<8x32xf32> -> vector<8x32xf32>
    %85 = vector.broadcast %50 : vector<1x32xf32> to vector<8x32xf32>
    %86 = arith.addf %84, %85 : vector<8x32xf32>
    %87 = arith.addf %73, %86 : vector<8x32xf32>
    %cst_36 = arith.constant dense<0.000000e+00> : vector<8xf32>
    %88 = vector.multi_reduction <add>, %87, %cst_36 [1] : vector<8x32xf32> to vector<8xf32>
    %89 = vector.shape_cast %88 : vector<8xf32> to vector<8x1xf32>
    %cst_37 = arith.constant 3.200000e+01 : f32
    %90 = vector.broadcast %cst_37 : f32 to vector<8x1xf32>
    %91 = arith.divf %89, %90 : vector<8x1xf32>
    %92 = vector.broadcast %91 : vector<8x1xf32> to vector<8x32xf32>
    %93 = arith.subf %87, %92 : vector<8x32xf32>
    %94 = arith.mulf %93, %93 : vector<8x32xf32>
    %cst_38 = arith.constant dense<0.000000e+00> : vector<8xf32>
    %95 = vector.multi_reduction <add>, %94, %cst_38 [1] : vector<8x32xf32> to vector<8xf32>
    %96 = vector.shape_cast %95 : vector<8xf32> to vector<8x1xf32>
    %cst_39 = arith.constant 3.200000e+01 : f32
    %97 = vector.broadcast %cst_39 : f32 to vector<8x1xf32>
    %98 = arith.divf %96, %97 : vector<8x1xf32>
    %99 = vector.broadcast %91 : vector<8x1xf32> to vector<8x32xf32>
    %100 = arith.subf %87, %99 : vector<8x32xf32>
    %cst_40 = arith.constant 9.99999974E-6 : f32
    %101 = vector.broadcast %cst_40 : f32 to vector<8x1xf32>
    %102 = arith.addf %98, %101 : vector<8x1xf32>
    %103 = math.rsqrt %102 : vector<8x1xf32>
    %104 = vector.broadcast %103 : vector<8x1xf32> to vector<8x32xf32>
    %105 = arith.mulf %100, %104 : vector<8x32xf32>
    %106 = vector.broadcast %48 : vector<1x32xf32> to vector<8x32xf32>
    %107 = arith.mulf %105, %106 : vector<8x32xf32>
    %108 = vector.broadcast %49 : vector<1x32xf32> to vector<8x32xf32>
    %109 = arith.addf %107, %108 : vector<8x32xf32>
    %c0_41 = arith.constant 0 : index
    %c0_42 = arith.constant 0 : index
    %110 = vector.load %arg11[%c0_41, %c0_42] : memref<8x32xf32, #tpu.memory_space<vmem>>, vector<8x32xf32>
    tpu.vector_store %arg11[%c0_41, %c0_42], %109 {strides = array<i32>} : memref<8x32xf32, #tpu.memory_space<vmem>>, vector<8x32xf32>,
    return
  }
  func.func @transform_0(%arg0: i32, %arg1: memref<2xi32, #tpu.memory_space<smem>>) -> (i32, i32) {
    %c0_i32 = arith.constant 0 : i32
    %c0_i32_0 = arith.constant 0 : i32
    return %arg0, %c0_i32 : i32, i32
  }
  func.func @transform_1(%arg0: i32, %arg1: memref<2xi32, #tpu.memory_space<smem>>) -> (i32, i32) {
    %c0_i32 = arith.constant 0 : i32
    %c0_i32_0 = arith.constant 0 : i32
    %c0_i32_1 = arith.constant 0 : i32
    return %c0_i32, %c0_i32_0 : i32, i32
  }
  func.func @transform_2(%arg0: i32, %arg1: memref<2xi32, #tpu.memory_space<smem>>) -> (i32, i32) {
    %c0_i32 = arith.constant 0 : i32
    %c0_i32_0 = arith.constant 0 : i32
    %c0_i32_1 = arith.constant 0 : i32
    return %c0_i32, %c0_i32_0 : i32, i32
  }
  func.func @transform_3(%arg0: i32, %arg1: memref<2xi32, #tpu.memory_space<smem>>) -> (i32, i32) {
    %c0_i32 = arith.constant 0 : i32
    %c0_i32_0 = arith.constant 0 : i32
    %c0_i32_1 = arith.constant 0 : i32
    return %c0_i32, %c0_i32_0 : i32, i32
  }
  func.func @transform_4(%arg0: i32, %arg1: memref<2xi32, #tpu.memory_space<smem>>) -> (i32, i32, i32) {
    %c0_i32 = arith.constant 0 : i32
    %c0_i32_0 = arith.constant 0 : i32
    %c0_i32_1 = arith.constant 0 : i32
    %c0_i32_2 = arith.constant 0 : i32
    return %c0_i32, %c0_i32_0, %c0_i32_1 : i32, i32, i32
  }
  func.func @transform_5(%arg0: i32, %arg1: memref<2xi32, #tpu.memory_space<smem>>) -> (i32, i32) {
    %c0_i32 = arith.constant 0 : i32
    %c0_i32_0 = arith.constant 0 : i32
    %c0_i32_1 = arith.constant 0 : i32
    return %c0_i32, %c0_i32_0 : i32, i32
  }
  func.func @transform_6(%arg0: i32, %arg1: memref<2xi32, #tpu.memory_space<smem>>) -> (i32, i32) {
    %c0_i32 = arith.constant 0 : i32
    %c0_i32_0 = arith.constant 0 : i32
    %c0_i32_1 = arith.constant 0 : i32
    return %c0_i32, %c0_i32_0 : i32, i32
  }
  func.func @transform_7(%arg0: i32, %arg1: memref<2xi32, #tpu.memory_space<smem>>) -> (i32, i32) {
    %c0_i32 = arith.constant 0 : i32
    %c0_i32_0 = arith.constant 0 : i32
    %c0_i32_1 = arith.constant 0 : i32
    return %c0_i32, %c0_i32_0 : i32, i32
  }
  func.func @transform_8(%arg0: i32, %arg1: memref<2xi32, #tpu.memory_space<smem>>) -> (i32, i32) {
    %c0_i32 = arith.constant 0 : i32
    %c0_i32_0 = arith.constant 0 : i32
    %c0_i32_1 = arith.constant 0 : i32
    return %c0_i32, %c0_i32_0 : i32, i32
  }
  func.func @transform_9(%arg0: i32, %arg1: memref<2xi32, #tpu.memory_space<smem>>) -> (i32, i32) {
    %c0_i32 = arith.constant 0 : i32
    %c0_i32_0 = arith.constant 0 : i32
    return %arg0, %c0_i32 : i32, i32
  }
}

</mosaic_0001>

<bundles_post_ra>
// kernel: tpu_custom_call.1
= control target key start
LH: loop header
LB: loop body
LE: loop exit
PB: predicated region body
PF: predicated region fallthrough
CT: control target
= control target key end

     0   :  { %s2417_s13 = smov [#allocation3]   ;;  %s2878_s0 = inlined_call_operand.hbm [shape: s32[2], index: 0, kind: input, shape index: {}]   ;;  %s2879_s1 = inlined_call_operand.vmem [shape: f32[16,32], index: 1, kind: input, shape index: {}]   ;;  %s2880_s2 = inlined_call_operand.vmem [shape: bf16[32,32], index: 2, kind: input, shape index: {}]   ;;  %s2881_s3 = inlined_call_operand.vmem [shape: bf16[32,32], index: 3, kind: input, shape index: {}]   ;;  %s2882_s4 = inlined_call_operand.hbm [shape: bf16[32,32], index: 4, kind: input, shape index: {}]   ;;  %s2883_s5 = inlined_call_operand.hbm [shape: bf16[4,8,32], index: 5, kind: input, shape index: {}]   ;;  %s2884_s6 = inlined_call_operand.hbm [shape: bf16[32,64], index: 6, kind: input, shape index: {}]   ;;  %s2885_s7 = inlined_call_operand.vmem [shape: bf16[64,32], index: 7, kind: input, shape index: {}]   ;;  %s2886_s8 = inlined_call_operand.vmem [shape: f32[5,32], index: 8, kind: input, shape index: {}]   ;;  %s2887_s9 = inlined_call_operand.vmem [shape: f32[1,64], index: 9, kind: input, shape index: {}]   ;;  %s2888_s10 = inlined_call_operand.hbm [shape: f32[16,32], index: 10, kind: output, shape index: {}]  }
   0x1   :  { %16 = dma.hbm_to_smem %s2878_s0, 16, %s2417_s13, [#allocation2] }
   0x2   :  { %2387 = dma.done.wait [#allocation2], 16 }
   0x3   :  { %2388 = vsyncadd [#allocation2], 4294967280 }
   0x4   :  { %18 = sfence }
   0x5   :  { %19 = vsyncpa [#allocation5], 0 }
   0x6   :  { %20 = vsyncpa [#allocation8], 0 }
   0x7   :  { %21 = vsyncpa [#allocation6], 0 }
   0x8   :  { %23 = vsyncpa [#allocation6 + $0x1], 0  ;;  %s2489_s16 = smov 0   ;;  %s2491_s17 = smov 0  }
   0x9   :  { %s2493_s18 = smov 0   ;;  %s2495_s19 = smov 0  }
   0xa LB: > { %s2510_s0 = sadd.s32 4294967295, %s2415_s19   ;;  %s1938_s20 = sadd.s32 4294967294, %s2415_s19   ;;  %s2415_s19 = sphi %s2495_s19, %s2906_s19   ;;  %s2411_s18 = sphi %s2493_s18, %s2905_s18   ;;  %s2407_s17 = sphi %s2491_s17, %s2904_s17   ;;  %s2403_s16 = sphi %s2489_s16, %s2903_s16  }
   0xb   : > { %s2514_s21 = sadd.s32 1, %s2415_s19   ;;  %s230_s22 = sadd.s32 1, %s2411_s18 }
   0xc   : > { %s227_s23 = ssub.s32 %s2415_s19, %s2514_s21  ;;  %p240_p0 = scmp.ne.s32.totalorder %s2411_s18, %s2407_s17 }
   0xd   : > { %p228_p1 = scmp.eq.s32.totalorder %s227_s23, 0  ;;  %p241_p2 = scmp.eq.s32.totalorder %s2510_s0, 1 }
   0xe   : > { %p246_p3 = scmp.ne.s32.totalorder %s2407_s17, %s2403_s16  ;;  %p247_p4 = scmp.eq.s32.totalorder %s1938_s20, 1 }
   0xf   : > { %s2525_s24 = scalar_select %p228_p1, %s2411_s18, %s230_s22  }
  0x10   : > { %p2527_p5 = por %p241_p2, %p240_p0  ;;  %p2531_p6 = por %p247_p4, %p246_p3 }
  0x11   : > { %p1939_p7 = scmp.ge.s32.totalorder %s2415_s19, 1  ;;  %p254_p8 = scmp.lt.s32.totalorder %s2415_s19, 3 }
  0x12   : > { %s2891_s25 = scalar_select %p2527_p5, 1, 0 }
  0x13   : > { %s2892_s26 = scalar_select %p2531_p6, 1, 0 }
  0x14   : > { %p2889_p9 = scmp.eq.s32.totalorder %s2510_s0, 0  ;;  %p2538_p10 = pnand %p1939_p7, %p254_p8 }
  0x15   : > { %s2418_s28 = smov [#allocation7]   ;;  %s2419_s11 = smov [#allocation4]  }
  0x16   : > { %p2161_p11 = pneg %p2538_p10  ;;  %s285_s29 = sshll.u32 %s2418_s28, 4  ;;  %s286_s29 = int_to_ptr.vmem [resolvable:$true] %s285_s29 }
  0x17   : > { %s272_s12 = sshll.u32 %s2419_s11, 4  ;;  %s2420_s13 = smov [#allocation9]   ;;  %s273_s12 = int_to_ptr.vmem [resolvable:$true] %s272_s12 }
  0x18   : > { %p2546_p12 = pnand %p2889_p9, %p2161_p11  ;;  %s298_s14 = sshll.u32 %s2420_s13, 4  ;;  %s299_s14 = int_to_ptr.vmem [resolvable:$true] %s298_s14 }
  0x19   : > { %s2278_s15 = scalar_lea.vmem %s286_s29, 256  ;;  %p2286_p3 = scmp.lt.s32.totalorder %s286_s29, %s286_s29 }
  0x1a   : > { %p2269_p13 = pneg %p2546_p12  ;;  %p2279_p0 = scmp.ne.s32.totalorder %s286_s29, %s2278_s15 }
  0x1b   : > { %p2287_p4 = scmp.lt.s32.totalorder %s2278_s15, %s2278_s15 }
  0x1c   : > { %p2281_p1 = pnand %p2279_p0, %p2269_p13 }
  0x1d   : > { %p2288_p7 = por %p2287_p4, %p2286_p3 }
  0x1e   : > { %p2282_p2 = pneg %p2281_p1 }
  0x20   : > { %p2289_p8 = pnand %p2288_p7, %p2282_p2 }
  0x22   : > { %2292 = shalt.err (!%p2289_p8)
}
  0x23   : > { %s2421_s20 = smov 64   ;;  %s2422_s22 = smov 4  }
  0x24   : > { %2167 = dma.hbm_to_vmem [thread:$0]  (!%p2546_p12), %s2883_s5, 256, %s286_s29, [#allocation8], %s2421_s20, %s2421_s20, %s2422_s22  }
  0x25   : > { %s2304_s11 = scalar_lea.vmem %s273_s12, 256  ;;  %p2312_p9 = scmp.lt.s32.totalorder %s273_s12, %s273_s12 }
  0x26   : > { %p2305_p11 = scmp.ne.s32.totalorder %s273_s12, %s2304_s11  ;;  %p2313_p6 = scmp.lt.s32.totalorder %s2304_s11, %s2304_s11 }
  0x28   : > { %p2307_p0 = pnand %p2305_p11, %p2269_p13  ;;  %p2314_p3 = por %p2313_p6, %p2312_p9 }
  0x2a   : > { %p2308_p1 = pneg %p2307_p0 }
  0x2c   : > { %p2315_p2 = pnand %p2314_p3, %p2308_p1 }
  0x2e   : > { %2318 = shalt.err (!%p2315_p2)
}
  0x2f   : > { %2164 = dma.hbm_to_vmem [thread:$0]  (!%p2546_p12), %s2882_s4, 256, %s273_s12, [#allocation5], %s2421_s20, %s2421_s20, %s2422_s22  }
  0x30   : > { %s2330_s29 = scalar_lea.vmem %s299_s14, 256  ;;  %p2338_p11 = scmp.lt.s32.totalorder %s299_s14, %s299_s14 }
  0x31   : > { %p2331_p4 = scmp.ne.s32.totalorder %s299_s14, %s2330_s29  ;;  %p2339_p0 = scmp.lt.s32.totalorder %s2330_s29, %s2330_s29 }
  0x33   : > { %p2333_p7 = pnand %p2331_p4, %p2269_p13  ;;  %p2340_p5 = por %p2339_p0, %p2338_p11 }
  0x35   : > { %p2334_p8 = pneg %p2333_p7 }
  0x37   : > { %p2341_p6 = pnand %p2340_p5, %p2334_p8 }
  0x39   : > { %2344 = shalt.err (!%p2341_p6)
}
  0x3a   : > { %2170 = dma.hbm_to_vmem [thread:$0]  (!%p2546_p12), %s2884_s6, 256, %s299_s14, [#allocation8], %s2421_s20, %s2421_s20, %s2422_s22  }
  0x3b   : > { %330 = sbr.rel (%p2538_p10) target bundleno = 2412 (0x96c), region = 56  ;;  %p2895_p9 = scmp.eq.s32.totalorder (!%p2538_p10), %s2510_s0, 0 }
  0x40   : > { %2390 = dma.done.wait (%p2895_p9), [#allocation5], 256   ;;  %p2896_p13 = pmov %p2895_p9 }
  0x41   : > { %p2897_p1 = pmov %p2895_p9 }
  0x42   : > { %2392 = vsyncadd (%p2896_p13), [#allocation5], 4294967040 }
  0x43   : > { %2394 = dma.done.wait (%p2897_p1), [#allocation8], 512   ;;  %p2898_p5 = pmov %p2897_p1 }
  0x44   : > { %p373_p3 = scmp.lt.s32.totalorder %s2510_s0, 1  ;;  %v2423_v0 = vmov 0.0   ;;  %vm2424_vm0 = vmmov 0   ;;  %v2227_v1 = vld [vmem:[%s2880_s2 + $0x8] sm:$0xff]   ;;  %v2228_v2 = vld [vmem:[%s2880_s2] sm:$0xff]   ;;  %vm396_vm1 = vcmask 261120   ;;  %v567_v19 = vlaneseq }
  0x45   : > { %2396 = vsyncadd (%p2898_p5), [#allocation8], 4294966784  ;;  %2031 = vmatprep.subr.bf16.mxu1 %v2423_v0  ;;  %2035 = vmatprep.mubr.msk.bf16.mxu1 %vm2424_vm0, %v2423_v0  ;;  %v2229_v4 = vld [vmem:[%s2881_s3 + $0x8] sm:$0xff]   ;;  %v2230_v6 = vld [vmem:[%s2881_s3] sm:$0xff]   ;;  %s2426_s12 = smov 120   ;;  %s2427_s14 = smov 112  }
  0x46   : > { %s374_s27 = scalar_select %p373_p3, %s2510_s0, 1  ;;  %2047 = vmatprep.subr.bf16.mxu0 %v2423_v0  ;;  %2051 = vmatprep.mubr.msk.bf16.mxu0 %vm2424_vm0, %v2423_v0  ;;  %v2231_v12 = vld [vmem:[#allocation4 + $0x8] sm:$0xff]   ;;  %v2232_v15 = vld [vmem:[#allocation4] sm:$0xff]   ;;  %v2428_v17 = vmov 1983009808   ;;  %v2640_v23 = vshrl.u32 %v567_v19, 7 }
  0x47   : > { %2032 = vmatpush3.bf16.msra.mxu1 %v2227_v1  ;;  %2048 = vmatpush3.bf16.msra.mxu0 %v2231_v12  ;;  %v565_v18 = vunpack.c.l.s4 %v2428_v17  ;;  %v2429_v20 = vmov 1934713408   ;;  %vm1002_vm2 = vcmask 64512   ;;  %vm1253_vm4 = vcmask 1043456   ;;  %s370_s22 = sand.u32 1, %s2407_s17   ;;  %s1987_s13 = sshll.u32 %s2510_s0, 7 }
  0x48   : > { %s1949_s30 = sshll.u32 %s374_s27, 3  ;;  %2033 = vmatprep.subr.bf16.mxu1 %v2423_v0  ;;  %2049 = vmatprep.subr.bf16.mxu0 %v2423_v0  ;;  %v597_v21 = vunpack.c.l.s4 %v2429_v20  ;;  %vm1765_vm5 = vcmask 523264   ;;  %s1948_s11 = sshll.u32 %s370_s22, 3 }
  0x49   : > { %s376_s20 = scalar_lea.vmem %s2879_s1, %s1949_s30  ;;  %s2425_s30 = smov 104   ;;  %v566_v22 = vunpack.c.0.s8 %v565_v18 }
  0x4a   : > { %v2603_v3 = vld [vmem:[%s376_s20] sm:$0xff]  ;;  %v598_v26 = vunpack.c.0.s8 %v597_v21  ;;  %s1191_s20 = sld [smem:[#allocation3 + %s2510_s0]]  ;;  %s372_s15 = scalar_lea.vmem [#allocation10], %s1948_s11 }
  0x4b   : > { %v379_v5 = vpack.c.bf16 %v2603_v3, %v2603_v3  ;;  %2034 = vmatpush3.bf16.msra.mxu1 %v2228_v2  ;;  %2050 = vmatpush3.bf16.msra.mxu0 %v2232_v15  ;;  %v2643_v27 = vsub.s32 %v566_v22, %v2640_v23  ;;  %s1848_s29 = sshll.u32 %s372_s15, 4  ;;  %s1846_s27 = scalar_lea.hbm %s2888_s10, %s1987_s13  ;;  %s1849_s29 = int_to_ptr.vmem [resolvable:$true] %s1848_s29 }
  0x4c   : > { %2039 = vmatprep.subr.bf16.mxu1 %v2423_v0  ;;  %2061 = vmatprep.subr.bf16.mxu0 %v2423_v0  ;;  %v2646_v34 = vsub.s32 %v598_v26, %v2640_v23  ;;  %p2901_p12 = scmp.ne.s32.totalorder %s2891_s25, 0 }
  0x4e   : > { %2036 = vmatmul.mubr.msk.bf16.vlgmr.msra.gmra.mxu1 %vm396_vm1, %v379_v5  ;;  %2052 = vmatmul.mubr.msk.bf16.vlgmr.msra.gmra.mxu0 %vm396_vm1, %v379_v5 }
  0x4f   : > { %2040 = vmatpush3.bf16.msra.mxu1 %v2229_v4  ;;  %2043 = vmatprep.mubr.msk.bf16.mxu1 %vm2424_vm0, %v2423_v0 }
  0x50   : > { %2041 = vmatprep.subr.bf16.mxu1 %v2423_v0  ;;  %2063 = vmatprep.mubr.msk.bf16.mxu0 %vm2424_vm0, %v2423_v0 }
  0x53   : > { %2042 = vmatpush3.bf16.msra.mxu1 %v2230_v6 }
  0x54   : > { %2055 = vmatprep.subr.bf16.mxu1 %v2423_v0 }
  0x56   : > { %2044 = vmatmul.mubr.msk.bf16.vlgmr.msra.gmra.mxu1 %vm396_vm1, %v379_v5 }
  0x57   : > { %2057 = vmatprep.mubr.msk.bf16.mxu1 %vm2424_vm0, %v2423_v0 }
 0x10e   : > { %v2623_v7 = vpop.f32.mrf.mxu1 }
 0x110   : > { %v2037_v8 = vpop.f32.mrf.mxu1 }
 0x112   : > { %v437_v9 = vpop.f32.mrf.mxu1 }
 0x114   : > { %v2038_v10 = vpop.f32.mrf.mxu1 }
 0x116   : > { %v490_v11 = vpop.f32.mrf.mxu1 }
 0x117   : > { %709 = vrot.lane.b32.xlu1 %v490_v11, %s2425_s30  ;;  %703 = vrot.lane.b32.xlu0 %v490_v11, %s2426_s12 }
 0x118   : > { %v2045_v13 = vpop.f32.mrf.mxu1 }
 0x11a   : > { %v493_v14 = vpop.f32.mrf.mxu1 }
 0x11b   : > { %553 = vrot.lane.b32.xlu1 %v2623_v7, %s2426_s12  ;;  %706 = vrot.lane.b32.xlu0 %v490_v11, %s2427_s14 }
 0x11c   : > { %v2046_v16 = vpop.f32.mrf.mxu1 }
 0x11f   : > { %559 = vrot.lane.b32.xlu1 %v2623_v7, %s2425_s30  ;;  %556 = vrot.lane.b32.xlu0 %v2623_v7, %s2427_s14 }
 0x189   : > { %v710_v24 = vpop.permute.xlu1 %709  ;;  %v704_v25 = vpop.permute.xlu0 %703 }
 0x18a   : > { %v728_v28 = vcombine.low %v704_v25, %v710_v24  ;;  %v729_v29 = vcombine.high %v704_v25, %v710_v24 }
 0x18c   : > { %v736_v35 = vrot.slane %v728_v28, %v2643_v27  ;;  %v743_v36 = vrot.slane %v729_v29, %v2643_v27 }
 0x18d   : > { %v554_v30 = vpop.permute.xlu1 %553  ;;  %v707_v31 = vpop.permute.xlu0 %706 }
 0x18e   : > { %v712_v32 = vcombine.low %v490_v11, %v707_v31  ;;  %v713_v33 = vcombine.high %v490_v11, %v707_v31 }
 0x190   : > { %v720_v37 = vrot.slane %v712_v32, %v2643_v27  ;;  %v727_v38 = vrot.slane %v713_v33, %v2643_v27 }
 0x191   : > { %v560_v39 = vpop.permute.xlu1 %559  ;;  %v557_v40 = vpop.permute.xlu0 %556 }
 0x192   : > { %v744_v41 = vcombine.low %v720_v37, %v736_v35  ;;  %v745_v42 = vcombine.high %v720_v37, %v736_v35  ;;  %v760_v43 = vcombine.low %v727_v38, %v743_v36  ;;  %v761_v44 = vcombine.high %v727_v38, %v743_v36 }
 0x193   : > { %v578_v45 = vcombine.low %v554_v30, %v560_v39  ;;  %v579_v46 = vcombine.high %v554_v30, %v560_v39  ;;  %v562_v47 = vcombine.low %v2623_v7, %v557_v40  ;;  %v563_v48 = vcombine.high %v2623_v7, %v557_v40 }
 0x194   : > { %v752_v49 = vrot.slane %v744_v41, %v2646_v34  ;;  %v759_v50 = vrot.slane %v745_v42, %v2646_v34  ;;  %v768_v51 = vrot.slane %v760_v43, %v2646_v34  ;;  %v775_v52 = vrot.slane %v761_v44, %v2646_v34 }
 0x195   : > { %v586_v53 = vrot.slane %v578_v45, %v2643_v27  ;;  %v593_v54 = vrot.slane %v579_v46, %v2643_v27  ;;  %v570_v55 = vrot.slane %v562_v47, %v2643_v27  ;;  %v577_v56 = vrot.slane %v563_v48, %v2643_v27 }
 0x196   : > { %v780_v57 = vcombine.low %v752_v49, %v759_v50  ;;  %v1961_v58 = vcombine.high %v752_v49, %v759_v50  ;;  %v796_v59 = vcombine.low %v768_v51, %v775_v52  ;;  %v1962_v60 = vcombine.high %v768_v51, %v775_v52 }
 0x197   : > { %v594_v61 = vcombine.low %v570_v55, %v586_v53  ;;  %v595_v62 = vcombine.high %v570_v55, %v586_v53  ;;  %v610_v63 = vcombine.low %v577_v56, %v593_v54  ;;  %v611_v1 = vcombine.high %v577_v56, %v593_v54 }
 0x198   : > { %v787_v2 = vrot.slane %v780_v57, %v2643_v27  ;;  %v795_v4 = vrot.slane %v1961_v58, %v2643_v27  ;;  %v803_v5 = vrot.slane %v796_v59, %v2643_v27  ;;  %v811_v6 = vrot.slane %v1962_v60, %v2643_v27  ;;  %v2702_v59 = vpop.f32.mrf.mxu0 }
 0x199   : > { %v602_v7 = vrot.slane %v594_v61, %v2646_v34  ;;  %v609_v8 = vrot.slane %v595_v62, %v2646_v34  ;;  %v618_v9 = vrot.slane %v610_v63, %v2646_v34  ;;  %v625_v10 = vrot.slane %v611_v1, %v2646_v34 }
 0x19a   : > { %v812_v11 = vcombine.low %v787_v2, %v795_v4  ;;  %v828_v12 = vcombine.low %v803_v5, %v811_v6  ;;  %v813_v13 = vcombine.high %v787_v2, %v795_v4  ;;  %v829_v14 = vcombine.high %v803_v5, %v811_v6  ;;  %v2053_v60 = vpop.f32.mrf.mxu0 }
 0x19b   : > { %v630_v15 = vcombine.low %v602_v7, %v609_v8  ;;  %v1959_v16 = vcombine.high %v602_v7, %v609_v8  ;;  %v646_v17 = vcombine.low %v618_v9, %v625_v10  ;;  %v1960_v18 = vcombine.high %v618_v9, %v625_v10 }
 0x19c   : > { %v820_v20 = vrot.slane %v812_v11, %v2646_v34  ;;  %v836_v21 = vrot.slane %v828_v12, %v2646_v34  ;;  %v827_v30 = vrot.slane %v813_v13, %v2646_v34  ;;  %v843_v31 = vrot.slane %v829_v14, %v2646_v34  ;;  %v549_v61 = vpop.f32.mrf.mxu0 }
 0x19d   : > { %v637_v22 = vrot.slane %v630_v15, %v2643_v27  ;;  %v645_v24 = vrot.slane %v1959_v16, %v2643_v27  ;;  %v653_v25 = vrot.slane %v646_v17, %v2643_v27  ;;  %v661_v26 = vrot.slane %v1960_v18, %v2643_v27 }
 0x19e   : > { %v844_v28 = vcombine.low %v820_v20, %v836_v21  ;;  %v845_v29 = vcombine.high %v820_v20, %v836_v21  ;;  %v846_v41 = vcombine.low %v827_v30, %v843_v31  ;;  %v847_v42 = vcombine.high %v827_v30, %v843_v31  ;;  %v2054_v62 = vpop.f32.mrf.mxu0 }
 0x19f   : > { %v662_v32 = vcombine.low %v637_v22, %v645_v24  ;;  %v678_v33 = vcombine.low %v653_v25, %v661_v26  ;;  %v663_v43 = vcombine.high %v637_v22, %v645_v24  ;;  %v679_v44 = vcombine.high %v653_v25, %v661_v26 }
 0x1a0   : > { %v848_v35 = vpack.c.bf16 %v844_v28, %v844_v28  ;;  %v849_v36 = vpack.c.bf16 %v845_v29, %v845_v29  ;;  %v850_v47 = vpack.c.bf16 %v846_v41, %v846_v41  ;;  %v851_v48 = vpack.c.bf16 %v847_v42, %v847_v42 }
 0x1a1   : > { %v670_v37 = vrot.slane %v662_v32, %v2646_v34  ;;  %v686_v38 = vrot.slane %v678_v33, %v2646_v34  ;;  %v677_v51 = vrot.slane %v663_v43, %v2646_v34  ;;  %v693_v52 = vrot.slane %v679_v44, %v2646_v34 }
 0x1a2   : > { %v1007_v39 = vsel %vm1002_vm2, %v848_v35, 0  ;;  %v1053_v40 = vsel %vm1002_vm2, %v849_v36, 0  ;;  %v1099_v53 = vsel %vm1002_vm2, %v850_v47, 0  ;;  %v1145_v54 = vsel %vm1002_vm2, %v851_v48, 0 }
 0x1a3   : > { %2056 = vmatpush3.bf16.xpose.msra.mxu1 %v1007_v39  ;;  %2062 = vmatpush3.bf16.xpose.msra.mxu0 %v1053_v40  ;;  %v694_v45 = vcombine.low %v670_v37, %v686_v38  ;;  %v695_v46 = vcombine.high %v670_v37, %v686_v38  ;;  %v696_v55 = vcombine.low %v677_v51, %v693_v52  ;;  %v1193_v63 = vand.u32 127, %v567_v19 }
 0x1a4   : > { %2067 = vmatprep.subr.bf16.mxu1 %v2423_v0  ;;  %2073 = vmatprep.subr.bf16.mxu0 %v2423_v0  ;;  %v697_v56 = vcombine.high %v677_v51, %v693_v52  ;;  %v1194_v1 = vstv %s1191_s20 }
 0x1a5   : > { %v698_v49 = vpack.c.bf16 %v694_v45, %v694_v45  ;;  %v699_v50 = vpack.c.bf16 %v695_v46, %v695_v46  ;;  %v700_v57 = vpack.c.bf16 %v696_v55, %v696_v55  ;;  %vm2706_vm3 = vcmp.lt.s32.totalorder %v1193_v63, %v1194_v1 }
 0x1a6   : > { %v701_v58 = vpack.c.bf16 %v697_v56, %v697_v56 }
 0x1aa   : > { %2058 = vmatmul.mubr.msk.bf16.vlgmr.msra.gmra.mxu1 %vm1002_vm2, %v698_v49  ;;  %2064 = vmatmul.mubr.msk.bf16.vlgmr.msra.gmra.mxu0 %vm1002_vm2, %v699_v50 }
 0x1ab   : > { %2068 = vmatpush3.bf16.xpose.msra.mxu1 %v1099_v53  ;;  %2074 = vmatpush3.bf16.xpose.msra.mxu0 %v1145_v54 }
 0x1ac   : > { %2069 = vmatprep.mubr.msk.bf16.mxu1 %vm2424_vm0, %v2423_v0  ;;  %2075 = vmatprep.mubr.msk.bf16.mxu0 %vm2424_vm0, %v2423_v0 }
 0x1ad   : > { %2079 = vmatprep.subr.bf16.mxu1 %v2423_v0  ;;  %2085 = vmatprep.subr.bf16.mxu0 %v2423_v0 }
 0x1b2   : > { %2070 = vmatmul.mubr.msk.bf16.vlgmr.msra.gmra.mxu1 %vm1002_vm2, %v700_v57  ;;  %2076 = vmatmul.mubr.msk.bf16.vlgmr.msra.gmra.mxu0 %vm1002_vm2, %v701_v58 }
 0x1b3   : > { %2081 = vmatprep.mubr.msk.bf16.mxu1 %vm2424_vm0, %v2423_v0  ;;  %2087 = vmatprep.mubr.msk.bf16.mxu0 %vm2424_vm0, %v2423_v0 }
 0x26a   : > { %v1043_v2 = vpop.f32.mrf.mxu1  ;;  %v1089_v4 = vpop.f32.mrf.mxu0 }
 0x26b   : > { %v1187_v6 = vmul.f32 0.35355338, %v1043_v2  ;;  %v1188_v7 = vmul.f32 0.35355338, %v1089_v4 }
 0x26c   : > { %v2059_v8 = vpop.f32.mrf.mxu1  ;;  %v2065_v9 = vpop.f32.mrf.mxu0 }
 0x26d   : > { %v1199_v10 = vsel %vm2706_vm3, %v1188_v7, -1000000.0  ;;  %v1198_v11 = vsel %vm2706_vm3, %v1187_v6, -1000000.0 }
 0x26e   : > { %v1046_v12 = vpop.f32.mrf.mxu1  ;;  %v1092_v13 = vpop.f32.mrf.mxu0  ;;  %v1205_v19 = vsel %vm1002_vm2, %v1199_v10, -inf  ;;  %v1202_v14 = vsel %vm1002_vm2, %v1198_v11, -inf }
 0x26f   : > { %1206 = vmax.xlane.f32.xlu1 %v1205_v19  ;;  %1203 = vmax.xlane.f32.xlu0 %v1202_v14 }
 0x270   : > { %v2060_v15 = vpop.f32.mrf.mxu1  ;;  %v2066_v16 = vpop.f32.mrf.mxu0 }
 0x272   : > { %v1135_v17 = vpop.f32.mrf.mxu1  ;;  %v1181_v18 = vpop.f32.mrf.mxu0 }
 0x273   : > { %v1189_v20 = vmul.f32 0.35355338, %v1135_v17  ;;  %v1190_v21 = vmul.f32 0.35355338, %v1181_v18 }
 0x274   : > { %v2071_v22 = vpop.f32.mrf.mxu1  ;;  %v2077_v24 = vpop.f32.mrf.mxu0 }
 0x275   : > { %v1200_v25 = vsel %vm2706_vm3, %v1189_v20, -1000000.0  ;;  %v1201_v30 = vsel %vm2706_vm3, %v1190_v21, -1000000.0 }
 0x276   : > { %v1138_v26 = vpop.f32.mrf.mxu1  ;;  %v1184_v28 = vpop.f32.mrf.mxu0  ;;  %v1208_v29 = vsel %vm1002_vm2, %v1200_v25, -inf  ;;  %v1211_v33 = vsel %vm1002_vm2, %v1201_v30, -inf }
 0x277   : > { %1209 = vmax.xlane.f32.xlu0 %v1208_v29 }
 0x278   : > { %v2072_v31 = vpop.f32.mrf.mxu1  ;;  %v2078_v32 = vpop.f32.mrf.mxu0 }
 0x27b   : > { %1212 = vmax.xlane.f32.xlu0 %v1211_v33 }
 0x280   : > { %853 = vrot.lane.b32.xlu1 %v2702_v59, %s2426_s12  ;;  %s2345_s12 = scalar_lea.vmem %s1849_s29, 128 }
 0x281   : > { %p2346_p10 = scmp.ne.s32.totalorder %s1849_s29, %s2345_s12 }
 0x283   : > { %p2347_p2 = pnand %p2346_p10, %p2901_p12 }
 0x285   : > { %p2348_p4 = pneg %p2347_p2 }
 0x2f8   : > { %v1207_v35 = vpop.xlane.xlu1 %1206  ;;  %v1204_v36 = vpop.xlane.xlu0 %1203 }
 0x2f9   : > { %v1215_v37 = vsub.f32 %v1199_v10, %v1207_v35  ;;  %v1214_v38 = vsub.f32 %v1198_v11, %v1204_v36 }
 0x2fb   : > { %v1220_v39 = vmul.f32 1.442695, %v1215_v37  ;;  %v1218_v40 = vmul.f32 1.442695, %v1214_v38 }
 0x2fc   : > { %v854_v55 = vpop.permute.xlu1 %853 }
 0x2fd   : > { %2239 = vpow2.f32 %v1220_v39 }
 0x2fe   : > { %2241 = vpow2.f32 %v1218_v40 }
 0x300   : > { %v1210_v45 = vpop.xlane.xlu0 %1209 }
 0x301   : > { %v1216_v48 = vsub.f32 %v1200_v25, %v1210_v45 }
 0x303   : > { %v1222_v50 = vmul.f32 1.442695, %v1216_v48 }
 0x304   : > { %v1213_v46 = vpop.xlane.xlu0 %1212 }
 0x305   : > { %v1217_v47 = vsub.f32 %v1201_v30, %v1213_v46 }
 0x307   : > { %v1224_v49 = vmul.f32 1.442695, %v1217_v47 }
 0x309   : > { %2243 = vpow2.f32 %v1224_v49 }
 0x30a   : > { %v2724_v41 = vpop.eup %2239  ;;  %2245 = vpow2.f32 %v1222_v50 }
 0x30b   : > { %v2726_v42 = vpop.eup %2241  ;;  %v1229_v43 = vsel %vm1002_vm2, %v2724_v41, 0.0 }
 0x30c   : > { %v1226_v44 = vsel %vm1002_vm2, %v2726_v42, 0.0  ;;  %1230 = vadd.xlane.f32.xlu0 %v1229_v43 }
 0x30d   : > { %1227 = vadd.xlane.f32.xlu1 %v1226_v44 }
 0x316   : > { %v2736_v51 = vpop.eup %2243 }
 0x317   : > { %v2738_v52 = vpop.eup %2245  ;;  %v1235_v53 = vsel %vm1002_vm2, %v2736_v51, 0.0 }
 0x318   : > { %v1232_v54 = vsel %vm1002_vm2, %v2738_v52, 0.0 }
 0x31e   : > { %859 = vrot.lane.b32.xlu1 %v2702_v59, %s2425_s30  ;;  %s1835_s30 = scalar_lea.sflag [#allocation6], %s370_s22 }
 0x322   : > { %856 = vrot.lane.b32.xlu0 %v2702_v59, %s2427_s14  ;;  %s2430_s14 = smov [#allocation10]  }
 0x323   : > { %s2349_s20 = sshll.u32 %s2430_s14, 4  ;;  %s2350_s20 = int_to_ptr.vmem [resolvable:$false] %s2349_s20 }
 0x324   : > { %s2351_s0 = scalar_lea.vmem %s2350_s20, 256  ;;  %p2352_p7 = scmp.lt.s32.totalorder %s1849_s29, %s2350_s20 }
 0x325   : > { %p2353_p8 = scmp.lt.s32.totalorder %s2351_s0, %s2345_s12 }
 0x327   : > { %p2354_p11 = por %p2353_p8, %p2352_p7 }
 0x329   : > { %p2355_p0 = pnand %p2354_p11, %p2348_p4 }
 0x341   : > { %1236 = vadd.xlane.f32.xlu0 %v1235_v53 }
 0x342   : > { %1233 = vadd.xlane.f32.xlu1 %v1232_v54 }
 0x395   : > { %v1231_v56 = vpop.xlane.xlu0 %1230 }
 0x396   : > { %v1228_v57 = vpop.xlane.xlu1 %1227  ;;  %2247 = vrcp.f32 %v1231_v56 }
 0x397   : > { %2249 = vrcp.f32 %v1228_v57 }
 0x399   : > { %v857_v58 = vpop.permute.xlu0 %856 }
 0x39a   : > { %v860_v60 = vpop.permute.xlu1 %859  ;;  %v862_v61 = vcombine.low %v2702_v59, %v857_v58  ;;  %v863_v62 = vcombine.high %v2702_v59, %v857_v58 }
 0x39b   : > { %v878_v63 = vcombine.low %v854_v55, %v860_v60  ;;  %v879_v1 = vcombine.high %v854_v55, %v860_v60  ;;  %v1439_v60 = vld [vmem:[#allocation7] sm:$0xf] }
 0x39c   : > { %v870_v2 = vrot.slane %v862_v61, %v2643_v27  ;;  %v877_v4 = vrot.slane %v863_v62, %v2643_v27  ;;  %v1440_v61 = vld [vmem:[#allocation7 + $0x4] sm:$0xf]  ;;  %v1447_v62 = vsel %vm1253_vm4, %v1439_v60, 0 }
 0x39d   : > { %v886_v5 = vrot.slane %v878_v63, %v2643_v27  ;;  %v893_v6 = vrot.slane %v879_v1, %v2643_v27  ;;  %v1442_v63 = vld [vmem:[#allocation7 + $0xc] sm:$0xf] }
 0x39f   : > { %v894_v7 = vcombine.low %v870_v2, %v886_v5  ;;  %v895_v8 = vcombine.high %v870_v2, %v886_v5  ;;  %v910_v9 = vcombine.low %v877_v4, %v893_v6  ;;  %v911_v10 = vcombine.high %v877_v4, %v893_v6 }
 0x3a1   : > { %v902_v11 = vrot.slane %v894_v7, %v2646_v34  ;;  %v909_v59 = vrot.slane %v895_v8, %v2646_v34  ;;  %v918_v12 = vrot.slane %v910_v9, %v2646_v34  ;;  %v925_v13 = vrot.slane %v911_v10, %v2646_v34 }
 0x3a2   : > { %v1585_v7 = vsel %vm1253_vm4, %v1442_v63, 0  ;;  %v1657_v63 = vsub.s32 1, %v2640_v23 }
 0x3a3   : > { %v930_v19 = vcombine.low %v902_v11, %v909_v59  ;;  %v1963_v14 = vcombine.high %v902_v11, %v909_v59  ;;  %v946_v15 = vcombine.low %v918_v12, %v925_v13  ;;  %v1964_v16 = vcombine.high %v918_v12, %v925_v13  ;;  %v2248_v28 = vpop.eup %2247 }
 0x3a4   : > { %v2250_v33 = vpop.eup %2249  ;;  %v1243_v43 = vmul.f32 %v2248_v28, %v2724_v41 }
 0x3a5   : > { %v937_v17 = vrot.slane %v930_v19, %v2643_v27  ;;  %v945_v18 = vrot.slane %v1963_v14, %v2643_v27  ;;  %v953_v20 = vrot.slane %v946_v15, %v2643_v27  ;;  %v961_v21 = vrot.slane %v1964_v16, %v2643_v27 }
 0x3a6   : > { %v1242_v40 = vmul.f32 %v2250_v33, %v2726_v42  ;;  %v1247_v48 = vpack.c.bf16 %v1243_v43, %v1243_v43 }
 0x3a7   : > { %v962_v22 = vcombine.low %v937_v17, %v945_v18  ;;  %v978_v24 = vcombine.low %v953_v20, %v961_v21  ;;  %v963_v25 = vcombine.high %v937_v17, %v945_v18  ;;  %v979_v26 = vcombine.high %v953_v20, %v961_v21 }
 0x3a9   : > { %v970_v29 = vrot.slane %v962_v22, %v2646_v34  ;;  %v986_v30 = vrot.slane %v978_v24, %v2646_v34  ;;  %v977_v31 = vrot.slane %v963_v25, %v2646_v34  ;;  %v993_v32 = vrot.slane %v979_v26, %v2646_v34 }
 0x3aa   : > { %v1246_v34 = vpack.c.bf16 %v1242_v40, %v1242_v40 }
 0x3ab   : > { %v994_v35 = vcombine.low %v970_v29, %v986_v30  ;;  %v995_v36 = vcombine.high %v970_v29, %v986_v30  ;;  %v996_v37 = vcombine.low %v977_v31, %v993_v32  ;;  %v997_v38 = vcombine.high %v977_v31, %v993_v32 }
 0x3ad   : > { %v998_v27 = vpack.c.bf16 %v994_v35, %v994_v35  ;;  %v999_v39 = vpack.c.bf16 %v995_v36, %v995_v36  ;;  %v1000_v46 = vpack.c.bf16 %v996_v37, %v996_v37  ;;  %v1001_v47 = vpack.c.bf16 %v997_v38, %v997_v38 }
 0x3af   : > { %v1255_v44 = vsel %vm1253_vm4, %v998_v27, 0  ;;  %v1301_v45 = vsel %vm1253_vm4, %v999_v39, 0  ;;  %v1347_v41 = vsel %vm1253_vm4, %v1000_v46, 0  ;;  %v1393_v42 = vsel %vm1253_vm4, %v1001_v47, 0 }
 0x3b0   : > { %2080 = vmatpush3.bf16.msra.mxu1 %v1255_v44  ;;  %2086 = vmatpush3.bf16.msra.mxu0 %v1301_v45 }
 0x3b1   : > { %2091 = vmatprep.subr.bf16.mxu1 %v2423_v0  ;;  %2097 = vmatprep.subr.bf16.mxu0 %v2423_v0 }
 0x3b3   : > { %2082 = vmatmul.mubr.msk.bf16.vlgmr.msra.gmra.mxu1 %vm1002_vm2, %v1246_v34  ;;  %2088 = vmatmul.mubr.msk.bf16.vlgmr.msra.gmra.mxu0 %vm1002_vm2, %v1247_v48 }
 0x3b4   : > { %2092 = vmatpush3.bf16.msra.mxu1 %v1347_v41  ;;  %2098 = vmatpush3.bf16.msra.mxu0 %v1393_v42 }
 0x3b5   : > { %2093 = vmatprep.mubr.msk.bf16.mxu1 %vm2424_vm0, %v2423_v0  ;;  %2099 = vmatprep.mubr.msk.bf16.mxu0 %vm2424_vm0, %v2423_v0 }
 0x3b6   : > { %2103 = vmatprep.subr.bf16.mxu1 %v2423_v0  ;;  %2109 = vmatprep.subr.bf16.mxu0 %v2423_v0 }
 0x3ca   : > { %v1237_v49 = vpop.xlane.xlu0 %1236 }
 0x3cb   : > { %v1234_v50 = vpop.xlane.xlu1 %1233  ;;  %2251 = vrcp.f32 %v1237_v49 }
 0x3cc   : > { %2253 = vrcp.f32 %v1234_v50 }
 0x3d8   : > { %v2252_v53 = vpop.eup %2251 }
 0x3d9   : > { %v2254_v54 = vpop.eup %2253  ;;  %v1245_v55 = vmul.f32 %v2252_v53, %v2736_v51  ;;  %v1493_v51 = vsel %vm1253_vm4, %v1440_v61, 0 }
 0x3da   : > { %v1244_v56 = vmul.f32 %v2254_v54, %v2738_v52  ;;  %v1441_v52 = vld [vmem:[#allocation7 + $0x8] sm:$0xf] }
 0x3db   : > { %v1249_v57 = vpack.c.bf16 %v1245_v55, %v1245_v55  ;;  %v1539_v6 = vsel %vm1253_vm4, %v1441_v52, 0  ;;  %v1634_v52 = vld [vmem:[%s2886_s8] sm:$0x1f] }
 0x3dc   : > { %v1248_v58 = vpack.c.bf16 %v1244_v56, %v1244_v56  ;;  %v2233_v56 = vld [vmem:[#allocation9 + $0x8] sm:$0xff]  }
 0x3dd   : > { %2100 = vmatmul.mubr.msk.bf16.vlgmr.msra.gmra.mxu0 %vm1002_vm2, %v1249_v57  ;;  %v2234_v57 = vld [vmem:[#allocation9] sm:$0xff]  }
 0x3de   : > { %2094 = vmatmul.mubr.msk.bf16.vlgmr.msra.gmra.mxu1 %vm1002_vm2, %v1248_v58  ;;  %2111 = vmatprep.mubr.msk.bf16.mxu0 %vm2424_vm0, %v2423_v0  ;;  %v2236_v58 = vld [vmem:[%s2885_s7 + $0x10] sm:$0xff]  }
 0x3df   : > { %2105 = vmatprep.mubr.msk.bf16.mxu1 %vm2424_vm0, %v2423_v0  ;;  %2104 = vmatpush3.bf16.msra.mxu1 %v1447_v62 }
 0x3e0   : > { %2110 = vmatpush3.bf16.msra.mxu0 %v1493_v51  ;;  %2115 = vmatprep.subr.bf16.mxu1 %v2423_v0  ;;  %v1652_v51 = vsub.s32 0, %v2640_v23 }
 0x3e1   : > { %2121 = vmatprep.subr.bf16.mxu0 %v2423_v0 }
 0x473   : > { %v1291_v1 = vpop.f32.mrf.mxu1  ;;  %v1337_v2 = vpop.f32.mrf.mxu0 }
 0x474   : > { %v1435_v4 = vpack.c.bf16 %v1291_v1, %v1291_v1  ;;  %v1436_v5 = vpack.c.bf16 %v1337_v2, %v1337_v2  ;;  %v1653_v1 = vrot.slane %v1634_v52, %v1652_v51 }
 0x475   : > { %v2083_v8 = vpop.f32.mrf.mxu1  ;;  %v2089_v9 = vpop.f32.mrf.mxu0 }
 0x476   : > { %2106 = vmatmul.mubr.msk.bf16.vlgmr.msra.gmra.mxu1 %vm1002_vm2, %v1435_v4  ;;  %2112 = vmatmul.mubr.msk.bf16.vlgmr.msra.gmra.mxu0 %vm1002_vm2, %v1436_v5  ;;  %v1658_v5 = vrot.slane %v1634_v52, %v1657_v63  ;;  %v2237_v9 = vld [vmem:[%s2885_s7 + $0x8] sm:$0xff]  }
 0x477   : > { %v1294_v10 = vpop.f32.mrf.mxu1  ;;  %v1340_v11 = vpop.f32.mrf.mxu0  ;;  %2116 = vmatpush3.bf16.msra.mxu1 %v1539_v6  ;;  %2122 = vmatpush3.bf16.msra.mxu0 %v1585_v7 }
 0x478   : > { %2117 = vmatprep.mubr.msk.bf16.mxu1 %vm2424_vm0, %v2423_v0  ;;  %2123 = vmatprep.mubr.msk.bf16.mxu0 %vm2424_vm0, %v2423_v0  ;;  %v2238_v10 = vld [vmem:[%s2885_s7] sm:$0xff]  }
 0x479   : > { %v2084_v59 = vpop.f32.mrf.mxu1  ;;  %v2090_v12 = vpop.f32.mrf.mxu0  ;;  %2127 = vmatprep.subr.bf16.mxu1 %v2423_v0  ;;  %2135 = vmatprep.subr.bf16.mxu0 %v2423_v0  ;;  %v1977_v11 = vld [vmem:[%s2887_s9] ss:$0 sm:$0xff] }
 0x49d   : > { %v1429_v13 = vpop.f32.mrf.mxu0 }
 0x49e   : > { %v1383_v19 = vpop.f32.mrf.mxu1  ;;  %v1438_v14 = vpack.c.bf16 %v1429_v13, %v1429_v13 }
 0x49f   : > { %v1437_v15 = vpack.c.bf16 %v1383_v19, %v1383_v19  ;;  %v2101_v16 = vpop.f32.mrf.mxu0 }
 0x4a0   : > { %v2095_v17 = vpop.f32.mrf.mxu1  ;;  %2124 = vmatmul.mubr.msk.bf16.vlgmr.msra.gmra.mxu0 %vm1002_vm2, %v1438_v14 }
 0x4a1   : > { %2118 = vmatmul.mubr.msk.bf16.vlgmr.msra.gmra.mxu1 %vm1002_vm2, %v1437_v15  ;;  %v1432_v18 = vpop.f32.mrf.mxu0  ;;  %2143 = vmatprep.mubr.msk.bf16.mxu0 %vm2424_vm0, %v2423_v0 }
 0x4a2   : > { %v1386_v20 = vpop.f32.mrf.mxu1  ;;  %2131 = vmatprep.mubr.msk.bf16.mxu1 %vm2424_vm0, %v2423_v0  ;;  %2128 = vmatpush3.bf16.msra.mxu1 %v2233_v56 }
 0x4a3   : > { %v2102_v21 = vpop.f32.mrf.mxu0  ;;  %2129 = vmatprep.subr.bf16.mxu1 %v2423_v0 }
 0x4a4   : > { %v2096_v22 = vpop.f32.mrf.mxu1 }
 0x4a6   : > { %2130 = vmatpush3.bf16.msra.mxu1 %v2234_v57 }
 0x536   : > { %v1483_v24 = vpop.f32.mrf.mxu1  ;;  %v1529_v25 = vpop.f32.mrf.mxu0 }
 0x537   : > { %v1627_v33 = vsel %vm396_vm1, %v1483_v24, 0.0  ;;  %v1628_v35 = vsel %vm396_vm1, %v1529_v25, 0.0 }
 0x538   : > { %v2107_v26 = vpop.f32.mrf.mxu1  ;;  %v2113_v28 = vpop.f32.mrf.mxu0  ;;  %v1629_v37 = vadd.f32 %v1628_v35, %v1627_v33 }
 0x53a   : > { %v1486_v29 = vpop.f32.mrf.mxu1  ;;  %v1532_v30 = vpop.f32.mrf.mxu0 }
 0x53c   : > { %v2108_v31 = vpop.f32.mrf.mxu1  ;;  %v2114_v32 = vpop.f32.mrf.mxu0 }
 0x560   : > { %v1621_v36 = vpop.f32.mrf.mxu0 }
 0x561   : > { %v1575_v38 = vpop.f32.mrf.mxu1  ;;  %v1632_v44 = vsel %vm396_vm1, %v1621_v36, 0.0 }
 0x562   : > { %v1630_v27 = vsel %vm396_vm1, %v1575_v38, 0.0  ;;  %v2125_v39 = vpop.f32.mrf.mxu0  ;;  %v1830_v38 = vsub.s32 3, %v2640_v23 }
 0x563   : > { %v1631_v40 = vadd.f32 %v1630_v27, %v1629_v37  ;;  %v2119_v43 = vpop.f32.mrf.mxu1  ;;  %v1825_v37 = vsub.s32 2, %v2640_v23 }
 0x564   : > { %v1624_v45 = vpop.f32.mrf.mxu0  ;;  %v1831_v43 = vrot.slane %v1634_v52, %v1830_v38 }
 0x565   : > { %v1633_v46 = vadd.f32 %v1632_v44, %v1631_v40  ;;  %v1578_v47 = vpop.f32.mrf.mxu1  ;;  %v1826_v27 = vrot.slane %v1634_v52, %v1825_v37 }
 0x566   : > { %v2126_v34 = vpop.f32.mrf.mxu0 }
 0x567   : > { %v2120_v48 = vpop.f32.mrf.mxu1  ;;  %v1635_v41 = vadd.f32 %v1633_v46, %v2603_v3  ;;  %v2235_v3 = vld [vmem:[%s2885_s7 + $0x18] sm:$0xff]  }
 0x568   : > { %2136 = vmatpush3.bf16.msra.mxu0 %v2235_v3 }
 0x569   : > { %v1636_v42 = vsel %vm396_vm1, %v1635_v41, 0.0  ;;  %2137 = vmatprep.subr.bf16.mxu0 %v2423_v0 }
 0x56a   : > { %1637 = vadd.xlane.f32.xlu0 %v1636_v42 }
 0x56c   : > { %2138 = vmatpush3.bf16.msra.mxu0 %v2236_v58 }
 0x56d   : > { %2139 = vmatprep.subr.bf16.mxu0 %v2423_v0 }
 0x570   : > { %2140 = vmatpush3.bf16.msra.mxu0 %v2237_v9 }
 0x571   : > { %2141 = vmatprep.subr.bf16.mxu0 %v2423_v0  ;;  %v1739_v0 = vsub.s32 4, %v2640_v23 }
 0x573   : > { %v1740_v17 = vrot.slane %v1634_v52, %v1739_v0 }
 0x574   : > { %2142 = vmatpush3.bf16.msra.mxu0 %v2238_v10 }
 0x5f3   : > { %v1638_v49 = vpop.xlane.xlu0 %1637 }
 0x5f4   : > { %v1640_v50 = vmul.f32 0.03125, %v1638_v49 }
 0x5f6   : > { %v1641_v53 = vsub.f32 %v1635_v41, %v1640_v50 }
 0x5f8   : > { %v1642_v54 = vmul.f32 %v1641_v53, %v1641_v53 }
 0x5fa   : > { %v1643_v55 = vsel %vm396_vm1, %v1642_v54, 0.0 }
 0x5fb   : > { %1644 = vadd.xlane.f32.xlu1 %v1643_v55 }
 0x684   : > { %v1645_v60 = vpop.xlane.xlu1 %1644 }
 0x685   : > { %v1646_v61 = vmul.f32 0.03125, %v1645_v60 }
 0x687   : > { %v1647_v62 = vadd.f32 1e-05, %v1646_v61 }
 0x689   : > { %2255 = vrsqrt.f32 %v1647_v62 }
 0x696   : > { %v2256_v2 = vpop.eup %2255 }
 0x697   : > { %v1649_v4 = vmul.f32 %v2256_v2, %v1641_v53 }
 0x699   : > { %v1654_v6 = vmul.f32 %v1653_v1, %v1649_v4 }
 0x69b   : > { %v1659_v7 = vadd.f32 %v1658_v5, %v1654_v6 }
 0x69d   : > { %v1660_v8 = vpack.c.bf16 %v1659_v7, %v1659_v7 }
 0x69f   : > { %2132 = vmatmul.mubr.msk.bf16.vlgmr.msra.gmra.mxu1 %vm396_vm1, %v1660_v8 }
 0x75f   : > { %v1721_v59 = vpop.f32.mrf.mxu1 }
 0x760   : > { %v1722_v12 = vadd.f32 %v1977_v11, %v1721_v59 }
 0x761   : > { %v2133_v13 = vpop.f32.mrf.mxu1 }
 0x762   : > { %v1727_v19 = vmax.f32 %v1722_v12, 0.0 }
 0x763   : > { %v1724_v14 = vpop.f32.mrf.mxu1 }
 0x764   : > { %v1728_v15 = vpack.c.bf16 %v1727_v19, %v1727_v19 }
 0x765   : > { %v2134_v16 = vpop.f32.mrf.mxu1 }
 0x766   : > { %2144 = vmatmul.mubr.msk.bf16.vlgmr.msra.gmra.mxu0 %vm1765_vm5, %v1728_v15 }
 0x826   : > { %v1803_v18 = vpop.f32.mrf.mxu0 }
 0x827   : > { %v1804_v20 = vadd.f32 %v1803_v18, %v1740_v17 }
 0x828   : > { %v2145_v21 = vpop.f32.mrf.mxu0 }
 0x829   : > { %v1809_v22 = vadd.f32 %v1804_v20, %v1659_v7 }
 0x82a   : > { %v1806_v24 = vpop.f32.mrf.mxu0 }
 0x82b   : > { %v1810_v25 = vsel %vm396_vm1, %v1809_v22, 0.0 }
 0x82c   : > { %1811 = vadd.xlane.f32.xlu0 %v1810_v25  ;;  %v2146_v26 = vpop.f32.mrf.mxu0 }
 0x8b5   : > { %v1812_v28 = vpop.xlane.xlu0 %1811 }
 0x8b6   : > { %v1813_v29 = vmul.f32 0.03125, %v1812_v28 }
 0x8b8   : > { %v1814_v30 = vsub.f32 %v1809_v22, %v1813_v29 }
 0x8ba   : > { %v1815_v31 = vmul.f32 %v1814_v30, %v1814_v30 }
 0x8bc   : > { %v1816_v32 = vsel %vm396_vm1, %v1815_v31, 0.0 }
 0x8bd   : > { %1817 = vadd.xlane.f32.xlu1 %v1816_v32 }
 0x946   : > { %v1818_v33 = vpop.xlane.xlu1 %1817 }
 0x947   : > { %v1819_v35 = vmul.f32 0.03125, %v1818_v33 }
 0x949   : > { %v1820_v36 = vadd.f32 1e-05, %v1819_v35 }
 0x94b   : > { %2257 = vrsqrt.f32 %v1820_v36 }
 0x958   : > { %v2258_v39 = vpop.eup %2257 }
 0x959   : > { %v1822_v40 = vmul.f32 %v2258_v39, %v1814_v30 }
 0x95b   : > { %v1827_v44 = vmul.f32 %v1826_v27, %v1822_v40 }
 0x95d   : > { %v1832_v45 = vadd.f32 %v1831_v43, %v1827_v44 }
 0x95f   : > { %1833 = vst.msk [vmem:[%s372_s15] sm:$0xff] %vm396_vm1, %v1832_v45 }
 0x960   : > { %2358 = shalt.err (!%p2355_p0)
}
 0x961   : > { %s2359_s11 = scalar_lea.hbm %s1846_s27, 128  ;;  %s2363_s15 = scalar_lea.hbm %s2888_s10, 256 }
 0x962   : > { %p2360_p6 = scmp.ne.s32.totalorder %s1846_s27, %s2359_s11  ;;  %p2364_p1 = scmp.lt.s32.totalorder %s1846_s27, %s2888_s10 }
 0x963   : > { %p2365_p5 = scmp.lt.s32.totalorder %s2363_s15, %s2359_s11 }
 0x964   : > { %p2361_p9 = pnand %p2360_p6, %p2901_p12 }
 0x965   : > { %p2366_p3 = por %p2365_p5, %p2364_p1 }
 0x966   : > { %p2362_p13 = pneg %p2361_p9 }
 0x968   : > { %p2367_p10 = pnand %p2366_p3, %p2362_p13 }
 0x96a   : > { %2370 = shalt.err (!%p2367_p10)
}
 0x96b   : > { %2159 = dma.vmem_to_hbm [thread:$0]  (%p2901_p12), %s1849_s29, 128, %s1846_s27, %s1835_s30  }
 0x96c PF: > { %p2181_p2 = scmp.ge.s32.totalorder %s2415_s19, 2  ;;  %s1860_s12 = sand.u32 1, %s2403_s16  }
 0x96d   : > { %p2902_p4 = scmp.ne.s32.totalorder %s2892_s26, 0  ;;  %s1861_s14 = scalar_lea.sflag [#allocation6], %s1860_s12 }
 0x96f   : > { %p2172_p7 = pnand %p2181_p2, %p2902_p4 }
 0x971   : > { %p2173_p8 = pneg %p2172_p7 }
 0x973   : > { %2398 = dma.done.wait (%p2173_p8), %s1861_s14, 128  }
 0x974   : > { %2400 = vsyncadd (%p2173_p8), %s1861_s14, 4294967168  ;;  %p26_p11 = scmp.ge.s32.totalorder %s2514_s21, 4   ;;  %s2903_s16 = smov %s2407_s17 }
 0x975   : > { %s2904_s17 = smov %s2411_s18  ;;  %s2905_s18 = smov %s2525_s24 }
 0x976   : > { %s2906_s19 = smov %s2514_s21  ;;  %28 = sbr.rel (!%p26_p11) target bundleno = 10 (0xa), region = 104 }
 0x97b   :  { %1866 = vsyncpa [#allocation5], 1 }
 0x97c   :  { %1868 = vsyncpa [#allocation5 + $0x1], 1 }
 0x97d   :  { %1869 = vsyncpa [#allocation8], 1 }
 0x97e   :  { %1870 = vsyncpa [#allocation6], 1 }
 0x97f   :  { %1872 = vsyncpa [#allocation6 + $0x1], 1 }

</bundles_post_ra>
